<compile_context>
chip_gen: v6e
topology: v6e:2x2x1
jax: 0.10.0
libtpu: 0.0.40
codegen_flags: <defaults>
</compile_context>

<pallas_src>
import jax
import jax.numpy as jnp
from jax.experimental import pallas as pl
from jax.experimental.pallas import tpu as pltpu


def _nearest_code_idx(z_ref, w_ref, w2h_ref):
    """Shared body: returns (codebook f32 [K,D], nearest-code idx int32 [TN])."""
    z = z_ref[...].astype(jnp.float32)      # [TN, D]
    w = w_ref[...].astype(jnp.float32)      # [K, D]

    # x @ W^T on the MXU, contracting dim 1 of both operands (no W.T relayout).
    xw = jax.lax.dot_general(
        z, w,
        dimension_numbers=(((1,), (1,)), ((), ())),
        preferred_element_type=jnp.float32)                   # [TN, K]

    # argmin ||x - w||^2 == argmax (x.w - 0.5*||w||^2); ||x||^2 is row-constant
    # and the 0.5 factor is pre-folded into w2h in the wrapper.
    scores = xw - w2h_ref[...]                                # [TN, K]
    return w, jnp.argmax(scores, axis=1).astype(jnp.int32)    # [K,D], [TN]


def _quantize_fused_kernel(z_ref, w_ref, w2h_ref, q_ref, idx_ref):
    """Indices + fused one-hot @ W gather (small-K fast path)."""
    w, idx = _nearest_code_idx(z_ref, w_ref, w2h_ref)
    idx_ref[...] = idx[None, :]                               # lane-dense (1, TN)

    # Embedding gather as one-hot @ W (MXU; coefficients are exactly 0/1).
    tn = idx.shape[0]
    k = w.shape[0]
    onehot = (idx[:, None] ==
              jax.lax.broadcasted_iota(jnp.int32, (tn, k), 1)).astype(jnp.float32)
    q_ref[...] = jax.lax.dot_general(
        onehot, w,
        dimension_numbers=(((1,), (0,)), ((), ())),
        preferred_element_type=jnp.float32).astype(q_ref.dtype)


def _argmin_kernel(z_ref, w_ref, w2h_ref, idx_ref):
    """Indices only (large-K path; gather done with jnp.take in the wrapper)."""
    _, idx = _nearest_code_idx(z_ref, w_ref, w2h_ref)
    idx_ref[...] = idx[None, :]


def quantize(z, weight, *, tn=1024, fuse_gather=None):
    """z: [N, code_dim] f32; weight: [size, code_dim] f32.

    Returns (quantized [N, code_dim] f32, encoding_indices [N] int32).
    """
    N, D = z.shape
    K, _ = weight.shape
    if fuse_gather is None:
        fuse_gather = K <= 1024   # small codebook -> keep the gather on the MXU

    # Hoisted codebook half-norms (0.5*||W||^2), computed once per call and
    # kept resident in VMEM -> no per-tile recompute, no per-tile scale-by-2.
    w2h = 0.5 * jnp.sum(weight.astype(jnp.float32) ** 2, axis=1)[None, :]   # [1, K]

    # ------------------------------------------------------------------ small
    if N <= tn:
        # Single-block, gridless call: whole problem resident in VMEM, no grid
        # step overhead (latency-bound toy sizes).
        if fuse_gather:
            q, idx2d = pl.pallas_call(
                _quantize_fused_kernel,
                out_shape=(
                    jax.ShapeDtypeStruct((N, D), jnp.float32),
                    jax.ShapeDtypeStruct((1, N), jnp.int32),
                ),
            )(z, weight, w2h)
            return q, idx2d[0]

        idx2d = pl.pallas_call(
            _argmin_kernel,
            out_shape=jax.ShapeDtypeStruct((1, N), jnp.int32),
        )(z, weight, w2h)
        idx = idx2d[0]
        return jnp.take(weight, idx, axis=0), idx

    # ------------------------------------------------------------------ tiled
    assert tn % 128 == 0, "tn must be a multiple of 128 (sublane/lane alignment)"
    grid_n = pl.cdiv(N, tn)

    # No padding of z and no slicing of quantized: a ragged last tile is
    # handled by Pallas block clipping (OOB reads padded, OOB writes dropped).
    in_specs = [
        pl.BlockSpec((tn, D), lambda i: (i, 0)),   # z tile (streamed)
        pl.BlockSpec((K, D), lambda i: (0, 0)),    # codebook (resident)
        pl.BlockSpec((1, K), lambda i: (0, 0)),    # 0.5*||W||^2 (resident)
    ]
    cp = pltpu.CompilerParams(
        # N axis is embarrassingly parallel -> megacore sharding.
        dimension_semantics=("parallel",),
        # Headroom below v7x's 64 MiB physical per-core VMEM; tiles here are
        # far smaller anyway.
        vmem_limit_bytes=48 * 1024 * 1024,
    )

    if fuse_gather:
        q, idx_slab = pl.pallas_call(
            _quantize_fused_kernel,
            out_shape=(
                jax.ShapeDtypeStruct((N, D), jnp.float32),       # quantized
                jax.ShapeDtypeStruct((grid_n, tn), jnp.int32),   # lane-dense idx
            ),
            grid_spec=pltpu.PrefetchScalarGridSpec(
                num_scalar_prefetch=0,
                grid=(grid_n,),
                in_specs=in_specs,
                out_specs=[
                    pl.BlockSpec((tn, D), lambda i: (i, 0)),     # quantized tile
                    pl.BlockSpec((1, tn), lambda i: (i, 0)),     # idx row (dense)
                ],
            ),
            compiler_params=cp,
        )(z, weight, w2h)
        return q, idx_slab.reshape(-1)[:N]

    idx_slab = pl.pallas_call(
        _argmin_kernel,
        out_shape=jax.ShapeDtypeStruct((grid_n, tn), jnp.int32),
        grid_spec=pltpu.PrefetchScalarGridSpec(
            num_scalar_prefetch=0,
            grid=(grid_n,),
            in_specs=in_specs,
            out_specs=pl.BlockSpec((1, tn), lambda i: (i, 0)),
        ),
        compiler_params=cp,
    )(z, weight, w2h)
    idx = idx_slab.reshape(-1)[:N]
    return jnp.take(weight, idx, axis=0), idx


def _check(z, w, q, idx):
    """Verify module semantics, tolerant to fp-rounding at near-tie codes."""
    xw = z @ w.T
    dist = ((z ** 2).sum(axis=1, keepdims=True)
            - 2.0 * xw
            + (w ** 2).sum(axis=1)[None, :])                          # [N, K]
    chosen = jnp.take_along_axis(dist, idx.astype(jnp.int32)[:, None], axis=1)[:, 0]
    # selected code is (within fp tolerance) the nearest code
    assert bool(jnp.all(chosen <= dist.min(axis=1) + 2e-3)), "not nearest code"
    # quantized rows are the selected codebook rows
    assert bool(jnp.allclose(q, w[idx], atol=5e-4, rtol=0.0)), "quantized != W[idx]"


if __name__ == "__main__":
    # Module config: Quantize(size=16, code_dim=32).
    size, code_dim = 16, 32

    key = jax.random.PRNGKey(0)
    k_w, k_z1, k_z2 = jax.random.split(key, 3)

    # embedding.weight ~ U(-1/size, 1/size), deterministic in-script init.
    weight = jax.random.uniform(
        k_w, (size, code_dim), dtype=jnp.float32,
        minval=-1.0 / size, maxval=1.0 / size)

    # --- Case 1: toy flattened input z = [8, 32] (gridless fused path) ------
    z_small = jax.random.normal(k_z1, (8, code_dim), dtype=jnp.float32)
    q_s, i_s = quantize(z_small, weight)
    q_s = jax.block_until_ready(q_s)
    i_s = jax.block_until_ready(i_s)
    assert q_s.shape == (8, code_dim) and i_s.shape == (8,) and i_s.dtype == jnp.int32
    _check(z_small, weight, q_s, i_s)

    # --- Case 2: flattened VQ-VAE batch (B=8, 16x16 grid -> N=2048 rows),
    #             exercises the tiled path: tn=1024, grid=(2,), codebook
    #             resident, no pad / no output slice, lane-dense idx slab. ----
    z_big = jax.random.normal(k_z2, (8 * 16 * 16, code_dim), dtype=jnp.float32)
    q_b, i_b = quantize(z_big, weight)
    q_b = jax.block_until_ready(q_b)
    i_b = jax.block_until_ready(i_b)
    assert q_b.shape == z_big.shape and i_b.shape == (z_big.shape[0],)
    _check(z_big, weight, q_b, i_b)

    # --- Case 3: indices-only kernel + wrapper jnp.take gather (the
    #             production large-K path), exercised at small shapes. --------
    q_t, i_t = quantize(z_small, weight, fuse_gather=False)
    q_t = jax.block_until_ready(q_t)
    i_t = jax.block_until_ready(i_t)
    assert bool(jnp.array_equal(i_t, i_s))
    _check(z_small, weight, q_t, i_t)

    print("KERNEL_OK")
</pallas_src>

<mosaic_0001>
module attributes {stable_mosaic.version = 11 : i64} {
  func.func @_quantize_fused_kernel(%arg0: memref<8x32xf32, #tpu.memory_space<vmem>>, %arg1: memref<16x32xf32, #tpu.memory_space<vmem>>, %arg2: memref<1x16xf32, #tpu.memory_space<vmem>>, %arg3: memref<8x32xf32, #tpu.memory_space<vmem>>, %arg4: memref<1x8xi32, #tpu.memory_space<vmem>>) attributes {dimension_semantics = [], scalar_prefetch = 0 : i64, scratch_operands = 0 : i64, tpu.core_type = #tpu.core_type<tc>} {
    %c0 = arith.constant 0 : index
    %c0_0 = arith.constant 0 : index
    %0 = vector.load %arg0[%c0, %c0_0] : memref<8x32xf32, #tpu.memory_space<vmem>>, vector<8x32xf32>
    %c0_1 = arith.constant 0 : index
    %c0_2 = arith.constant 0 : index
    %1 = vector.load %arg1[%c0_1, %c0_2] : memref<16x32xf32, #tpu.memory_space<vmem>>, vector<16x32xf32>
    %cst = arith.constant dense<0.000000e+00> : vector<8x16xf32>
    %2 = tpu.matmul %0, %1, %cst {dimension_numbers = #tpu.dot_dimension_numbers<[1], [1], [0], [0], [0, 0, 1, 0], [], []>} : vector<8x32xf32>, vector<16x32xf32>, vector<8x16xf32> -> vector<8x16xf32>
    %c0_3 = arith.constant 0 : index
    %c0_4 = arith.constant 0 : index
    %3 = vector.load %arg2[%c0_3, %c0_4] : memref<1x16xf32, #tpu.memory_space<vmem>>, vector<1x16xf32>
    %4 = vector.broadcast %3 : vector<1x16xf32> to vector<8x16xf32>
    %5 = arith.subf %2, %4 : vector<8x16xf32>
    %6 = tpu.reduce_index %5 {axis = 1 : i32, kind = #tpu.reduction_kind<arg_max>} : vector<8x16xf32> -> vector<8xi32>
    %7 = vector.shape_cast %6 : vector<8xi32> to vector<1x8xi32>
    %c0_5 = arith.constant 0 : index
    %c0_6 = arith.constant 0 : index
    %8 = vector.load %arg4[%c0_5, %c0_6] : memref<1x8xi32, #tpu.memory_space<vmem>>, vector<1x8xi32>
    tpu.vector_store %arg4[%c0_5, %c0_6], %7 {strides = array<i32>} : memref<1x8xi32, #tpu.memory_space<vmem>>, vector<1x8xi32>,
    %9 = vector.shape_cast %6 : vector<8xi32> to vector<8x1xi32>
    %10 = tpu.iota {dimensions = array<i32: 1>} : vector<8x16xi32>
    %11 = vector.broadcast %9 : vector<8x1xi32> to vector<8x16xi32>
    %12 = arith.cmpi eq, %11, %10 : vector<8x16xi32>
    %13 = arith.extui %12 : vector<8x16xi1> to vector<8x16xi32>
    %14 = arith.sitofp %13 : vector<8x16xi32> to vector<8x16xf32>
    %cst_7 = arith.constant dense<0.000000e+00> : vector<8x32xf32>
    %15 = tpu.matmul %14, %1, %cst_7 {dimension_numbers = #tpu.dot_dimension_numbers<[1], [0], [0], [1], [0, 0, 1, 1], [], []>} : vector<8x16xf32>, vector<16x32xf32>, vector<8x32xf32> -> vector<8x32xf32>
    %c0_8 = arith.constant 0 : index
    %c0_9 = arith.constant 0 : index
    %16 = vector.load %arg3[%c0_8, %c0_9] : memref<8x32xf32, #tpu.memory_space<vmem>>, vector<8x32xf32>
    tpu.vector_store %arg3[%c0_8, %c0_9], %15 {strides = array<i32>} : memref<8x32xf32, #tpu.memory_space<vmem>>, vector<8x32xf32>,
    return
  }
}

</mosaic_0001>

<bundles_post_ra>
// kernel: tpu_custom_call.1
= control target key start
LH: loop header
LB: loop body
LE: loop exit
PB: predicated region body
PF: predicated region fallthrough
CT: control target
= control target key end

     0   :  { %10 = vsyncpa [#allocation3], 0  ;;  %s428_s0 = inlined_call_operand.hbm [shape: f32[8,32], index: 0, kind: input, shape index: {}]   ;;  %s429_s1 = inlined_call_operand.hbm [shape: f32[16,32], index: 1, kind: input, shape index: {}]   ;;  %s430_s2 = inlined_call_operand.vmem [shape: f32[1,16], index: 2, kind: input, shape index: {}]   ;;  %s431_s3 = inlined_call_operand.hbm [shape: f32[8,32], index: 3, kind: output, shape index: {0}]   ;;  %s432_s4 = inlined_call_operand.hbm [shape: s32[1,8], index: 4, kind: output, shape index: {1}]  }
   0x1   :  { %11 = vsyncpa [#allocation6], 0 }
   0x2   :  { %12 = vsyncpa [#allocation4], 0 }
   0x3   :  { %13 = vsyncpa [#allocation9], 0  ;;  %s376_s15 = smov [#allocation2]   ;;  %s377_s17 = smov [#allocation5]  }
   0x4   :  { %s20_s16 = sshll.u32 %s376_s15, 4  ;;  %s29_s18 = sshll.u32 %s377_s17, 4  ;;  %s21_s16 = int_to_ptr.vmem [resolvable:$true] %s20_s16  ;;  %s30_s18 = int_to_ptr.vmem [resolvable:$true] %s29_s18 }
   0x5   :  { %s296_s19 = scalar_lea.vmem %s21_s16, 128  ;;  %p301_p1 = scmp.lt.s32.totalorder %s21_s16, %s21_s16 }
   0x6   :  { %p297_p0 = scmp.ne.s32.totalorder %s21_s16, %s296_s19  ;;  %p302_p2 = scmp.lt.s32.totalorder %s296_s19, %s296_s19 }
   0x8   :  { %p303_p3 = por %p302_p2, %p301_p1 }
   0xa   :  { %p304_p4 = pnand %p303_p3, %p297_p0 }
   0xc   :  { %307 = shalt.err (!%p304_p4)
}
   0xd   :  { %23 = dma.hbm_to_vmem [thread:$0]  %s428_s0, 128, %s21_s16, [#allocation3]  }
   0xe   :  { %s316_s22 = scalar_lea.vmem %s30_s18, 256  ;;  %p321_p6 = scmp.lt.s32.totalorder %s30_s18, %s30_s18 }
   0xf   :  { %p317_p5 = scmp.ne.s32.totalorder %s30_s18, %s316_s22  ;;  %p322_p7 = scmp.lt.s32.totalorder %s316_s22, %s316_s22 }
  0x11   :  { %p323_p8 = por %p322_p7, %p321_p6 }
  0x13   :  { %p324_p9 = pnand %p323_p8, %p317_p5 }
  0x15   :  { %327 = shalt.err (!%p324_p9)
}
  0x16   :  { %s378_s23 = smov 128   ;;  %s379_s24 = smov 8  }
  0x17   :  { %35 = dma.hbm_to_vmem [thread:$0]  %s429_s1, 256, %s30_s18, [#allocation6], %s378_s23, %s378_s23, %s379_s24  }
  0x18   :  { %368 = dma.done.wait [#allocation3], 128  }
  0x19   :  { %369 = vsyncadd [#allocation3], 4294967168 }
  0x1a   :  { %370 = dma.done.wait [#allocation6], 256  }
  0x1b   :  { %371 = vsyncadd [#allocation6], 4294967040  ;;  %v380_v0 = vmov 0.0   ;;  %vm381_vm0 = vmmov 0   ;;  %vm47_vm1 = vcmask 261120   ;;  %v46_v1 = vld [vmem:[#allocation5 + $0x8] sm:$0xff]  ;;  %v139_v9 = vlaneseq }
  0x1c   :  { %266 = vmatprep.subr.mxu0 %v380_v0  ;;  %270 = vmatprep.mubr.msk.f32.mxu0 %vm381_vm0, %v380_v0  ;;  %v45_v2 = vld [vmem:[#allocation5] sm:$0xff]  ;;  %v44_v3 = vld [vmem:[#allocation2] sm:$0xff]  ;;  %vm135_vm2 = vcmask 130048   ;;  %vm145_vm3 = vcmask 57344   ;;  %s382_s27 = smov [#allocation8]  }
  0x1d   :  { %273 = vmatprep.subr.mxu1 %v380_v0  ;;  %277 = vmatprep.mubr.msk.f32.mxu1 %vm381_vm0, %v380_v0  ;;  %v257_v4 = vld [vmem:[%s430_s2] ss:$0 sm:$0xff]  ;;  %v140_v10 = vand.u32 127, %v139_v9  ;;  %v142_v11 = vshrl.u32 %v139_v9, 7  ;;  %s240_s28 = sshll.u32 %s382_s27, 4  ;;  %s241_s28 = int_to_ptr.vmem [resolvable:$true] %s240_s28 }
  0x1e   :  { %267 = vmatpush3.xpose.msk.msra.mxu0 %vm47_vm1, %v46_v1  ;;  %274 = vmatpush3.msra.mxu1 %v46_v1  ;;  %s328_s2 = scalar_lea.vmem %s241_s28, 16  ;;  %s332_s29 = scalar_lea.vmem %s241_s28, 32 }
  0x1f   :  { %268 = vmatprep.subr.mxu0 %v380_v0  ;;  %275 = vmatprep.subr.mxu1 %v380_v0  ;;  %v143_v12 = vsub.s32 %v140_v10, %v142_v11  ;;  %p329_p10 = scmp.ne.s32.totalorder %s241_s28, %s328_s2  ;;  %p333_p11 = scmp.lt.s32.totalorder %s241_s28, %s241_s28 }
  0x20   :  { %276 = vmatpush3.msra.mxu1 %v45_v2  ;;  %p334_p12 = scmp.lt.s32.totalorder %s332_s29, %s328_s2 }
  0x22   :  { %269 = vmatpush3.xpose.msk.msra.mxu0 %vm47_vm1, %v45_v2  ;;  %p335_p13 = por %p334_p12, %p333_p11 }
  0x24   :  { %p336_p0 = pnand %p335_p13, %p329_p10 }
  0x25   :  { %271 = vmatmul.mubr.msk.f32.vlgmr.msra.gmra.mxu0 %vm47_vm1, %v44_v3 }
  0xe5   :  { %v123_v5 = vpop.f32.mrf.mxu0 }
  0xe6   :  { %v134_v6 = vsub.f32 %v123_v5, %v257_v4 }
  0xe7   :  { %v272_v7 = vpop.f32.mrf.mxu0 }
  0xe8   :  { %v136_v8 = vsel %vm135_vm2, %v134_v6, -inf }
  0xe9   :  { %137 = vmax.index.xlane.f32.xlu0 %v136_v8 }
 0x172   :  { %v138_v13 = vpop.xlane.xlu0 %137 }
 0x173   :  { %v144_v14 = vrot.slane %v138_v13, %v143_v12  ;;  %vm147_vm4 = vcmp.eq.s32.totalorder %v138_v13, %v140_v10 }
 0x174   :  { %v258_v15 = vsel %vm147_vm4, 1.0, %v380_v0 }
 0x175   :  { %278 = vmatmul.mubr.msk.f32.vlgmr.msra.gmra.mxu1 %vm135_vm2, %v258_v15  ;;  %146 = vst.msk [vmem:[#allocation8] sm:$0x1] %vm145_vm3, %v144_v14 }
 0x176   :  { %339 = shalt.err (!%p336_p0)
}
 0x177   :  { %243 = dma.vmem_to_hbm [thread:$0]  %s241_s28, 16, %s432_s4, [#allocation9]  }
 0x178   :  { %s383_s6 = smov [#allocation7]  }
 0x179   :  { %s230_s7 = sshll.u32 %s383_s6, 4  ;;  %s231_s7 = int_to_ptr.vmem [resolvable:$true] %s230_s7 }
 0x17a   :  { %s348_s8 = scalar_lea.vmem %s231_s7, 128  ;;  %p353_p2 = scmp.lt.s32.totalorder %s231_s7, %s231_s7 }
 0x17b   :  { %p349_p1 = scmp.ne.s32.totalorder %s231_s7, %s348_s8  ;;  %p354_p3 = scmp.lt.s32.totalorder %s348_s8, %s348_s8 }
 0x17d   :  { %p355_p4 = por %p354_p3, %p353_p2 }
 0x17f   :  { %p356_p5 = pnand %p355_p4, %p349_p1 }
 0x235   :  { %v219_v16 = vpop.f32.mrf.mxu1 }
 0x236   :  { %223 = vst.msk [vmem:[#allocation7] sm:$0xff] %vm47_vm1, %v219_v16 }
 0x237   :  { %v279_v17 = vpop.f32.mrf.mxu1 }
 0x238   :  { %359 = shalt.err (!%p356_p5)
}
 0x239   :  { %233 = dma.vmem_to_hbm [thread:$0]  %s231_s7, 128, %s431_s3, [#allocation4]  }
 0x23a   :  { %372 = dma.done.wait [#allocation4], 128  }
 0x23b   :  { %373 = vsyncadd [#allocation4], 4294967168 }
 0x23c   :  { %374 = dma.done.wait [#allocation9], 16  }
 0x23d   :  { %375 = vsyncadd [#allocation9], 4294967280 }
 0x23e   :  { %250 = vsyncpa [#allocation3], 1 }
 0x23f   :  { %251 = vsyncpa [#allocation6], 1 }
 0x240   :  { %252 = vsyncpa [#allocation4], 1 }
 0x241   :  { %253 = vsyncpa [#allocation9], 1 }

</bundles_post_ra>
